<compile_context>
chip_gen: v5e
topology: v5e:2x2
jax: 0.10.0
libtpu: 0.0.40
codegen_flags: <defaults>
</compile_context>

<pallas_src>
import jax
import jax.numpy as jnp
from jax.experimental import pallas as pl
from jax.experimental.pallas import tpu as pltpu


def _scse_apply_kernel(x_ref, cg_ref, ws_ref, bs_ref, o_ref):
    # x_ref block: (1, C, T) ; cg_ref: (1, C, 1) ; ws_ref: (C, 1) ; bs_ref: SMEM (1,)
    x = x_ref[0].astype(jnp.float32)                 # (C, T)
    c_gate = cg_ref[0]                               # (C, 1)  (already sigmoid'ed)
    ws = ws_ref[...]                                 # (C, 1)

    # sSE: per-pixel logit = sum_c x[c, p] * ws[c] + bs   (VPU mul + sublane reduce)
    s_logit = jnp.sum(x * ws, axis=0, keepdims=True) + bs_ref[0]   # (1, T)
    s_gate = jax.nn.sigmoid(s_logit)                                # (1, T)

    # out = x * (cSE + sSE): one broadcast add + one mul per element.
    o_ref[0] = (x * (c_gate + s_gate)).astype(o_ref.dtype)


def _pick_tile(hw, cap=2048):
    """Largest multiple of 128 that divides hw and is <= cap; fall back to hw."""
    best = None
    t = 128
    while t <= min(hw, cap):
        if hw % t == 0:
            best = t
        t += 128
    return best if best is not None else hw


def scse_forward(x_nchw, params):
    """SCSEModule forward. x_nchw: (B, C, H, W)."""
    B, C, H, W = x_nchw.shape
    HW = H * W

    # Free reshape: NCHW -> (B, C, HW). No transposes, no extra HBM traffic.
    x = x_nchw.reshape(B, C, HW)

    # ---- cSE branch hoisted to plain JAX (operates on a (B, C) tensor) ----
    pooled = jnp.mean(x.astype(jnp.float32), axis=2)                     # (B, C)
    h = jnp.maximum(pooled @ params["w1"].T + params["b1"], 0.0)         # (B, mid)
    c_gate = jax.nn.sigmoid(h @ params["w2"].T + params["b2"])           # (B, C)
    c_gate = c_gate.astype(jnp.float32).reshape(B, C, 1)

    ws = params["ws"].reshape(C, 1).astype(jnp.float32)                  # (C, 1)
    bs = params["bs"].reshape(1).astype(jnp.float32)                     # (1,) -> SMEM

    tile = _pick_tile(HW)
    grid = (B, HW // tile)

    out = pl.pallas_call(
        _scse_apply_kernel,
        out_shape=jax.ShapeDtypeStruct((B, C, HW), x_nchw.dtype),
        grid_spec=pltpu.PrefetchScalarGridSpec(
            num_scalar_prefetch=0,
            grid=grid,
            in_specs=[
                pl.BlockSpec((1, C, tile), lambda b, j: (b, 0, j)),     # x tile
                pl.BlockSpec((1, C, 1), lambda b, j: (b, 0, 0)),        # cSE gate
                pl.BlockSpec((C, 1), lambda b, j: (0, 0)),              # sSE weights
                pl.BlockSpec(memory_space=pltpu.MemorySpace.SMEM),      # sSE bias
            ],
            out_specs=pl.BlockSpec((1, C, tile), lambda b, j: (b, 0, j)),
        ),
        compiler_params=pltpu.CompilerParams(
            dimension_semantics=("parallel", "parallel")),
    )(x, c_gate, ws, bs)

    # Free reshape back to NCHW.
    return out.reshape(B, C, H, W)


def attention_forward(x, name=None, params=None):
    """Equivalent of the PyTorch `Attention` module."""
    if name is None:
        return x  # nn.Identity
    elif name == "scse":
        return scse_forward(x, params)
    else:
        raise ValueError("Attention {} is not implemented".format(name))


def init_scse_params(key, in_channels, reduction=16):
    mid = in_channels // reduction
    k1, k2, k3, k4, k5, k6 = jax.random.split(key, 6)
    # 1x1 convs == dense layers; deterministic synthetic init.
    return {
        "w1": jax.random.normal(k1, (mid, in_channels), jnp.float32) * 0.1,
        "b1": jax.random.normal(k2, (mid,), jnp.float32) * 0.1,
        "w2": jax.random.normal(k3, (in_channels, mid), jnp.float32) * 0.1,
        "b2": jax.random.normal(k4, (in_channels,), jnp.float32) * 0.1,
        "ws": jax.random.normal(k5, (in_channels,), jnp.float32) * 0.1,
        "bs": jax.random.normal(k6, (1,), jnp.float32) * 0.1,
    }


def _reference_scse(x, p):
    # Pure-JAX reference replicating the PyTorch math (NCHW).
    pooled = jnp.mean(x, axis=(2, 3))                               # (B, C)
    h = jnp.maximum(pooled @ p["w1"].T + p["b1"], 0.0)              # (B, mid)
    c = jax.nn.sigmoid(h @ p["w2"].T + p["b2"])[:, :, None, None]   # (B, C, 1, 1)
    s = jax.nn.sigmoid(
        jnp.einsum("bchw,c->bhw", x, p["ws"]) + p["bs"][0])[:, None]  # (B,1,H,W)
    return x * c + x * s


if __name__ == "__main__":
    key = jax.random.PRNGKey(0)
    kx, kp = jax.random.split(key)

    B, C, H, W = 2, 32, 16, 16      # reduction=16 -> mid channels = 2
    x = jax.random.normal(kx, (B, C, H, W), jnp.float32)
    params = init_scse_params(kp, in_channels=C, reduction=16)

    out = attention_forward(x, name="scse", params=params)
    out = jax.block_until_ready(out)

    ref = _reference_scse(x, params)
    assert out.shape == (B, C, H, W)
    assert jnp.allclose(out, ref, atol=1e-5, rtol=1e-5), "mismatch vs reference"

    print("KERNEL_OK")
</pallas_src>

<mosaic_0001>
module attributes {stable_mosaic.version = 11 : i64} {
  func.func @_scse_apply_kernel(%arg0: i32, %arg1: i32, %arg2: memref<1x32x256xf32, #tpu.memory_space<vmem>>, %arg3: memref<1x32x1xf32, #tpu.memory_space<vmem>>, %arg4: memref<32x1xf32, #tpu.memory_space<vmem>>, %arg5: memref<1xf32, #tpu.memory_space<smem>>, %arg6: memref<1x32x256xf32, #tpu.memory_space<vmem>>) attributes {dimension_semantics = [#tpu.dimension_semantics<parallel>, #tpu.dimension_semantics<parallel>], iteration_bounds = array<i64: 2, 1>, scalar_prefetch = 0 : i64, scratch_operands = 0 : i64, tpu.core_type = #tpu.core_type<tc>, window_params = [{transform_indices = @transform_0, window_bounds = array<i64: 1, 32, 256>}, {transform_indices = @transform_1, window_bounds = array<i64: 1, 32, 1>}, {pipeline_mode = #tpu.pipeline_mode<synchronous>, transform_indices = @transform_2, window_bounds = array<i64: 32, 1>}, {transform_indices = @transform_3, window_bounds = array<i64: 1>}, {transform_indices = @transform_4, window_bounds = array<i64: 1, 32, 256>}]} {
    %c0 = arith.constant 0 : index
    %c0_0 = arith.constant 0 : index
    %c0_1 = arith.constant 0 : index
    %0 = vector.load %arg2[%c0, %c0_0, %c0_1] : memref<1x32x256xf32, #tpu.memory_space<vmem>>, vector<1x32x256xf32>
    %1 = vector.shape_cast %0 : vector<1x32x256xf32> to vector<32x256xf32>
    %c0_2 = arith.constant 0 : index
    %c0_3 = arith.constant 0 : index
    %c0_4 = arith.constant 0 : index
    %2 = vector.load %arg3[%c0_2, %c0_3, %c0_4] : memref<1x32x1xf32, #tpu.memory_space<vmem>>, vector<1x32x1xf32>
    %3 = vector.shape_cast %2 : vector<1x32x1xf32> to vector<32x1xf32>
    %c0_5 = arith.constant 0 : index
    %c0_6 = arith.constant 0 : index
    %4 = vector.load %arg4[%c0_5, %c0_6] : memref<32x1xf32, #tpu.memory_space<vmem>>, vector<32x1xf32>
    %5 = vector.broadcast %4 : vector<32x1xf32> to vector<32x256xf32>
    %6 = arith.mulf %1, %5 : vector<32x256xf32>
    %cst = arith.constant dense<0.000000e+00> : vector<256xf32>
    %7 = vector.multi_reduction <add>, %6, %cst [0] : vector<32x256xf32> to vector<256xf32>
    %8 = vector.shape_cast %7 : vector<256xf32> to vector<1x256xf32>
    %c0_7 = arith.constant 0 : index
    %9 = memref.load %arg5[%c0_7] : memref<1xf32, #tpu.memory_space<smem>>
    %10 = vector.broadcast %9 : f32 to vector<1x256xf32>
    %11 = arith.addf %8, %10 : vector<1x256xf32>
    %12 = arith.negf %11 : vector<1x256xf32>
    %13 = math.exp %12 : vector<1x256xf32>
    %cst_8 = arith.constant 1.000000e+00 : f32
    %14 = vector.broadcast %cst_8 : f32 to vector<1x256xf32>
    %15 = arith.addf %14, %13 : vector<1x256xf32>
    %16 = arith.divf %14, %15 : vector<1x256xf32>
    %17 = vector.broadcast %3 : vector<32x1xf32> to vector<32x256xf32>
    %18 = vector.broadcast %16 : vector<1x256xf32> to vector<32x256xf32>
    %19 = arith.addf %17, %18 : vector<32x256xf32>
    %20 = arith.mulf %1, %19 : vector<32x256xf32>
    %c0_9 = arith.constant 0 : index
    %c0_10 = arith.constant 0 : index
    %c0_11 = arith.constant 0 : index
    %21 = vector.load %arg6[%c0_9, %c0_10, %c0_11] : memref<1x32x256xf32, #tpu.memory_space<vmem>>, vector<1x32x256xf32>
    %22 = vector.shape_cast %21 : vector<1x32x256xf32> to vector<32x256xf32>
    %23 = vector.shape_cast %20 : vector<32x256xf32> to vector<1x32x256xf32>
    tpu.vector_store %arg6[%c0_9, %c0_10, %c0_11], %23 {strides = array<i32>} : memref<1x32x256xf32, #tpu.memory_space<vmem>>, vector<1x32x256xf32>,
    return
  }
  func.func @transform_0(%arg0: i32, %arg1: i32) -> (i32, i32, i32) {
    %c0_i32 = arith.constant 0 : i32
    %c0_i32_0 = arith.constant 0 : i32
    return %arg0, %c0_i32, %arg1 : i32, i32, i32
  }
  func.func @transform_1(%arg0: i32, %arg1: i32) -> (i32, i32, i32) {
    %c0_i32 = arith.constant 0 : i32
    %c0_i32_0 = arith.constant 0 : i32
    %c0_i32_1 = arith.constant 0 : i32
    return %arg0, %c0_i32, %c0_i32_0 : i32, i32, i32
  }
  func.func @transform_2(%arg0: i32, %arg1: i32) -> (i32, i32) {
    %c0_i32 = arith.constant 0 : i32
    %c0_i32_0 = arith.constant 0 : i32
    %c0_i32_1 = arith.constant 0 : i32
    return %c0_i32, %c0_i32_0 : i32, i32
  }
  func.func @transform_3(%arg0: i32, %arg1: i32) -> i32 {
    %c0_i32 = arith.constant 0 : i32
    %c0_i32_0 = arith.constant 0 : i32
    return %c0_i32 : i32
  }
  func.func @transform_4(%arg0: i32, %arg1: i32) -> (i32, i32, i32) {
    %c0_i32 = arith.constant 0 : i32
    %c0_i32_0 = arith.constant 0 : i32
    return %arg0, %c0_i32, %arg1 : i32, i32, i32
  }
}

</mosaic_0001>

<bundles_post_ra>
// kernel: tpu_custom_call.1
= control target key start
LH: loop header
LB: loop body
LE: loop exit
PB: predicated region body
PF: predicated region fallthrough
CT: control target
= control target key end

     0   :  { %s954_s0 = inlined_call_operand.hbm [shape: f32[2,32,256], index: 0, kind: input, shape index: {}]   ;;  %s955_s1 = inlined_call_operand.vmem [shape: f32[2,32,1], index: 1, kind: input, shape index: {}]   ;;  %s956_s2 = inlined_call_operand.vmem [shape: f32[32,1], index: 2, kind: input, shape index: {}]   ;;  %s957_s3 = inlined_call_operand.<no memory space> [shape: f32[1], index: 3, kind: input, shape index: {}]   ;;  %s958_s4 = inlined_call_operand.hbm [shape: f32[2,32,256], index: 4, kind: output, shape index: {}]  }
   0x1   :  { %9 = sst [smem:[#allocation2]] %s957_s3 }
   0x2   :  { %10 = vsyncpa [#allocation4], 0 }
   0x3   :  { %12 = vsyncpa [#allocation4 + $0x1], 0 }
   0x4   :  { %13 = vsyncpa [#allocation5], 0 }
   0x5   :  { %15 = vsyncpa [#allocation5 + $0x1], 0  ;;  %s771_s17 = smov 0   ;;  %s773_s18 = smov 0  }
   0x6   :  { %s775_s19 = smov 0   ;;  %s777_s20 = smov 0  }
   0x7   :  { %s779_s21 = smov 0   ;;  %s781_s22 = smov 0  }
   0x8 LB: > { %s524_s3 = sadd.s32 4294967295, %s736_s22   ;;  %s525_s23 = sadd.s32 4294967294, %s736_s22   ;;  %s736_s22 = sphi %s781_s22, %s21_s22   ;;  %s732_s21 = sphi %s779_s21, %s967_s21   ;;  %s728_s20 = sphi %s777_s20, %s966_s20   ;;  %s724_s19 = sphi %s775_s19, %s965_s19   ;;  %s720_s18 = sphi %s773_s18, %s964_s18   ;;  %s716_s17 = sphi %s771_s17, %s963_s17  }
   0x9   : > { %s33_s24 = sadd.s32 1, %s732_s21  ;;  %s42_s25 = sadd.s32 1, %s724_s19 }
   0xa   : > { %p35_p0 = scmp.ge.s32.totalorder %s33_s24, 2  ;;  %p49_p1 = scmp.ne.s32.totalorder %s724_s19, %s720_s18 }
   0xb   : > { %p50_p2 = scmp.eq.s32.totalorder %s736_s22, 0  ;;  %p55_p3 = scmp.ne.s32.totalorder %s720_s18, %s716_s17 }
   0xc   : > { %s969_s24 = smov (%p35_p0, %s33_s24), 0  ;;  %p56_p5 = scmp.eq.s32.totalorder %s524_s3, 0 }
   0xd   : > { %p812_p4 = por %p50_p2, %p49_p1  ;;  %s37_s27 = ssub.s32 %s732_s21, %s969_s24 }
   0xe   : > { %p149_p6 = scmp.eq.s32.totalorder %s524_s3, 1  ;;  %p40_p7 = scmp.eq.s32.totalorder %s37_s27, 0 }
   0xf   : > { %p818_p8 = por %p56_p5, %p55_p3  ;;  %p155_p10 = scmp.eq.s32.totalorder %s525_s23, 1 }
  0x10   : > { %p822_p9 = por %p149_p6, %p49_p1  ;;  %p527_p12 = scmp.ge.s32.totalorder %s736_s22, 2 }
  0x11   : > { %s827_s30 = scalar_select %p40_p7, %s724_s19, %s42_s25  }
  0x12   : > { %p829_p11 = por %p155_p10, %p55_p3  ;;  %p558_p13 = scmp.lt.s32.totalorder %s736_s22, 2 }
  0x13   : > { %s181_s6 = sand.u32 1, %s724_s19   ;;  %s543_s8 = sshll.u32 %s732_s21, 6 }
  0x14   : > { %s528_s7 = sshll.u32 %s181_s6, 6  ;;  %s192_s11 = scalar_lea.hbm %s954_s0, %s543_s8 }
  0x15   : > { %s185_s12 = scalar_lea.vmem [#allocation3], %s528_s7  ;;  %s193_s14 = sshll.u32 %s192_s11, 4  ;;  %s194_s14 = int_to_ptr.hbm [resolvable:$true] %s193_s14 }
  0x16   : > { %s195_s13 = sshll.u32 %s185_s12, 4  ;;  %p551_p0 = pnand %p558_p13, %p812_p4  ;;  %s196_s13 = int_to_ptr.vmem [resolvable:$true] %s195_s13 }
  0x17   : > { %p531_p1 = scmp.ge.s32.totalorder %s736_s22, 1  ;;  %s182_s15 = scalar_lea.sflag [#allocation4], %s181_s6 }
  0x18   : > { %s738_s16 = smov 256   ;;  %s739_s3 = smov 16  }
  0x19   : > { %553 = dma.hbm_to_vmem [thread:$0]  (!%p551_p0), %s194_s14, 1024, %s196_s13, %s182_s15, %s738_s16, %s738_s16, %s739_s3  }
  0x1a   : > { %p211_p2 = scmp.lt.s32.totalorder %s736_s22, 3 }
  0x1c   : > { %p212_p3 = pnand %p531_p1, %p211_p2 }
  0x1d   : > { %s845_s23 = sand.u32 (!%p212_p3), 1, %s720_s18  }
  0x1e   : > { %215 = sbr.rel (%p212_p3) target bundleno = 227 (0xe3), region = 36  ;;  %s532_s25 = sshll.u32 (!%p212_p3), %s845_s23, 6 }
  0x1f   : > { %s218_s27 = scalar_lea.sflag (!%p212_p3), [#allocation4], %s845_s23  ;;  %s851_s26 = scalar_lea.vmem (!%p212_p3), [#allocation3], %s532_s25 }
  0x23   : > { %707 = dma.done.wait (%p818_p8), %s218_s27, 1024  }
  0x24   : > { %709 = vsyncadd (%p818_p8), %s218_s27, 4294966272  ;;  %p253_p4 = scmp.lt.s32.totalorder %s728_s20, 1  ;;  %v740_v0 = vmov 0   ;;  %v273_v1 = vld [vmem:[%s956_s2 + $0x10] sm:$0xff]  ;;  %v271_v2 = vld [vmem:[%s956_s2] sm:$0xff]  ;;  %s321_s27 = sld [smem:[#allocation2]] }
  0x25   : > { %614 = vset.pattern.permute.xlu1 %v740_v0  ;;  %613 = vset.pattern.permute.xlu0 %v740_v0  ;;  %v274_v4 = vld [vmem:[%s956_s2 + $0x18] sm:$0xff]  ;;  %v272_v5 = vld [vmem:[%s956_s2 + $0x8] sm:$0xff]  ;;  %v875_v11 = vld [vmem:[%s851_s26] sm:$0xff]  ;;  %s674_s14 = scalar_lea.hbm %s958_s4, 128 }
  0x26   : > { %s254_s6 = scalar_select %p253_p4, %s728_s20, 1  ;;  %615 = vset.pattern.permute.xlu2 %v740_v0  ;;  %287 = vperm.xlu1 %614, %v273_v1   ;;  %v878_v12 = vld [vmem:[%s851_s26 + $0x8] sm:$0xff]  ;;  %v881_v13 = vld [vmem:[%s851_s26 + $0x10] sm:$0xff]  ;;  %v884_v14 = vld [vmem:[%s851_s26 + $0x18] sm:$0xff] }
  0x27   : > { %277 = vperm.xlu0 %613, %v271_v2   ;;  %v887_v15 = vld [vmem:[%s851_s26 + $0x20] sm:$0xff]  ;;  %v890_v16 = vld [vmem:[%s851_s26 + $0x28] sm:$0xff]  ;;  %v897_v23 = vld [vmem:[%s851_s26 + $0x30] sm:$0xff] }
  0x28   : > { %s544_s7 = sshll.u32 %s254_s6, 5  ;;  %v900_v24 = vld [vmem:[%s851_s26 + $0x38] sm:$0xff]  ;;  %s545_s26 = sshll.u32 %s728_s20, 6 }
  0x29   : > { %s257_s13 = scalar_lea.vmem %s955_s1, %s544_s7  ;;  %s421_s8 = scalar_lea.hbm %s958_s4, %s545_s26 }
  0x2a   : > { %v267_v3 = vld [vmem:[%s257_s13] sm:$0xff]  ;;  %v268_v6 = vld [vmem:[%s257_s13 + $0x8] sm:$0xff]  ;;  %v270_v7 = vld [vmem:[%s257_s13 + $0x18] sm:$0xff]  ;;  %v322_v45 = vstv %s321_s27  ;;  %s251_s20 = scalar_lea.vmem [#allocation6], %s532_s25  ;;  %s424_s10 = sshll.u32 %s421_s8, 4  ;;  %s425_s10 = int_to_ptr.hbm [resolvable:$true] %s424_s10 }
  0x2b   : > { %365 = vperm.xlu2 %615, %v267_v3   ;;  %v269_v8 = vld [vmem:[%s257_s13 + $0x10] sm:$0xff]  ;;  %s422_s9 = sshll.u32 %s251_s20, 4  ;;  %s408_s25 = scalar_lea.sflag [#allocation5], %s845_s23  ;;  %s423_s9 = int_to_ptr.vmem [resolvable:$true] %s422_s9 }
  0x2c   : > { %s668_s11 = sshra.s32 %s425_s10, 4  ;;  %s669_s11 = int_to_ptr.hbm [resolvable:$true] %s668_s11 }
  0x2d   : > { %s670_s28 = scalar_lea.hbm %s669_s11, 64  ;;  %p675_p8 = scmp.lt.s32.totalorder %s669_s11, %s958_s4 }
  0x2e   : > { %292 = vperm.xlu1 %614, %v274_v4   ;;  %p671_p5 = scmp.ne.s32.totalorder %s669_s11, %s670_s28  ;;  %p676_p10 = scmp.lt.s32.totalorder %s674_s14, %s670_s28 }
  0x2f   : > { %282 = vperm.xlu0 %613, %v272_v5  }
  0x30   : > { %p672_p6 = pnand %p671_p5, %p822_p9  ;;  %p677_p13 = por %p676_p10, %p675_p8 }
  0x32   : > { %p673_p7 = pneg %p672_p6 }
  0x33   : > { %370 = vperm.xlu2 %615, %v268_v6  }
  0x34   : > { %p678_p0 = pnand %p677_p13, %p673_p7 }
  0x36   : > { %380 = vperm.xlu1 %614, %v270_v7  }
  0x37   : > { %375 = vperm.xlu0 %613, %v269_v8  }
  0x85   : > { %v366_v60 = vpop.permute.xlu2 %365 }
  0x98   : > { %v288_v9 = vpop.permute.xlu1 %287 }
  0x99   : > { %v278_v10 = vpop.permute.xlu0 %277  ;;  %v299_v25 = vmul.f32 %v288_v9, %v887_v15  ;;  %v300_v26 = vmul.f32 %v288_v9, %v890_v16 }
  0x9a   : > { %v295_v18 = vmul.f32 %v278_v10, %v875_v11  ;;  %v296_v19 = vmul.f32 %v278_v10, %v878_v12 }
  0xa0   : > { %v293_v22 = vpop.permute.xlu1 %292 }
  0xa1   : > { %v283_v17 = vpop.permute.xlu0 %282  ;;  %v301_v29 = vmul.f32 %v293_v22, %v897_v23  ;;  %v302_v30 = vmul.f32 %v293_v22, %v900_v24 }
  0xa2   : > { %v297_v20 = vmul.f32 %v283_v17, %v881_v13  ;;  %v298_v21 = vmul.f32 %v283_v17, %v884_v14 }
  0xa4   : > { %v303_v27 = vadd.f32 %v297_v20, %v295_v18  ;;  %v312_v28 = vadd.f32 %v298_v21, %v296_v19 }
  0xa6   : > { %v304_v31 = vadd.f32 %v303_v27, %v299_v25  ;;  %v313_v32 = vadd.f32 %v312_v28, %v300_v26 }
  0xa8   : > { %v305_v33 = vadd.f32 %v304_v31, %v301_v29  ;;  %v314_v34 = vadd.f32 %v313_v32, %v302_v30  ;;  %v381_v10 = vpop.permute.xlu1 %380  ;;  %v371_v29 = vpop.permute.xlu2 %370 }
  0xa9   : > { %v376_v19 = vpop.permute.xlu0 %375 }
  0xaa   : > { %v306_v35 = vrot.slane %v305_v33, 4  ;;  %v315_v36 = vrot.slane %v314_v34, 4 }
  0xac   : > { %v307_v37 = vadd.f32 %v306_v35, %v305_v33  ;;  %v316_v38 = vadd.f32 %v315_v36, %v314_v34 }
  0xae   : > { %v308_v39 = vrot.slane %v307_v37, 2  ;;  %v317_v40 = vrot.slane %v316_v38, 2 }
  0xb0   : > { %v309_v41 = vadd.f32 %v308_v39, %v307_v37  ;;  %v318_v42 = vadd.f32 %v317_v40, %v316_v38 }
  0xb2   : > { %v310_v43 = vrot.slane %v309_v41, 1  ;;  %v319_v44 = vrot.slane %v318_v42, 1 }
  0xb4   : > { %v311_v46 = vadd.f32 %v310_v43, %v309_v41  ;;  %v320_v47 = vadd.f32 %v319_v44, %v318_v42 }
  0xb6   : > { %v323_v48 = vadd.f32 %v322_v45, %v311_v46  ;;  %v324_v49 = vadd.f32 %v322_v45, %v320_v47 }
  0xb8   : > { %v536_v50 = vmul.f32 -1.442695, %v323_v48  ;;  %v537_v51 = vmul.f32 -1.442695, %v324_v49 }
  0xba   : > { %616 = vpow2.f32 %v536_v50 }
  0xbb   : > { %618 = vpow2.f32 %v537_v51 }
  0xc0   : > { %v617_v52 = vpop.eup %616 }
  0xc1   : > { %v619_v53 = vpop.eup %618  ;;  %v331_v54 = vadd.f32 1.0, %v617_v52 }
  0xc2   : > { %v332_v55 = vadd.f32 1.0, %v619_v53 }
  0xc3   : > { %620 = vrcp.f32 %v331_v54  ;;  %v344_v62 = vand.u32 2147483648, %v331_v54  ;;  %v342_v1 = vand.u32 2147483647, %v331_v54  ;;  %vm338_vm2 = vweird.f32 %v331_v54 }
  0xc4   : > { %622 = vrcp.f32 %v332_v55  ;;  %v359_v2 = vand.u32 2147483648, %v332_v55  ;;  %v357_v4 = vand.u32 2147483647, %v332_v55  ;;  %vm353_vm4 = vweird.f32 %v332_v55 }
  0xc5   : > { %v345_v6 = vor.u32 1.1754944e-38, %v344_v62  ;;  %vm343_vm5 = vcmp.eq.f32.partialorder %v342_v1, 8.507059e+37 }
  0xc6   : > { %v360_v9 = vor.u32 1.1754944e-38, %v359_v2  ;;  %vm358_vm7 = vcmp.eq.f32.partialorder %v357_v4, 8.507059e+37 }
  0xc9   : > { %v621_v56 = vpop.eup %620 }
  0xca   : > { %v623_v57 = vpop.eup %622  ;;  %v334_v58 = vmul.f32 %v621_v56, %v331_v54  ;;  %vm339_vm0 = vweird.f32 %v621_v56 }
  0xcb   : > { %v349_v59 = vmul.f32 %v623_v57, %v332_v55  ;;  %vm354_vm1 = vweird.f32 %v623_v57  ;;  %vm340_vm3 = vmor %vm338_vm2, %vm339_vm0 }
  0xcc   : > { %v335_v61 = vsub.f32 1.0, %v334_v58  ;;  %vm355_vm6 = vmor %vm353_vm4, %vm354_vm1 }
  0xcd   : > { %v350_v63 = vsub.f32 1.0, %v349_v59 }
  0xce   : > { %v336_v0 = vmul.f32 %v621_v56, %v335_v61 }
  0xcf   : > { %v351_v3 = vmul.f32 %v623_v57, %v350_v63 }
  0xd0   : > { %v337_v5 = vadd.f32 %v621_v56, %v336_v0 }
  0xd1   : > { %v352_v7 = vadd.f32 %v623_v57, %v351_v3 }
  0xd2   : > { %v341_v8 = vsel %vm340_vm3, %v621_v56, %v337_v5 }
  0xd3   : > { %v346_v17 = vsel %vm343_vm5, %v345_v6, %v341_v8  ;;  %v356_v18 = vsel %vm355_vm6, %v623_v57, %v352_v7 }
  0xd4   : > { %v361_v20 = vsel %vm358_vm7, %v360_v9, %v356_v18  ;;  %v389_v21 = vadd.f32 %v381_v10, %v346_v17  ;;  %v387_v22 = vadd.f32 %v376_v19, %v346_v17  ;;  %v383_v25 = vadd.f32 %v366_v60, %v346_v17 }
  0xd5   : > { %v390_v26 = vadd.f32 %v381_v10, %v361_v20  ;;  %v388_v27 = vadd.f32 %v376_v19, %v361_v20  ;;  %v384_v28 = vadd.f32 %v366_v60, %v361_v20  ;;  %v385_v32 = vadd.f32 %v371_v29, %v346_v17 }
  0xd6   : > { %v397_v30 = vmul.f32 %v389_v21, %v897_v23  ;;  %v395_v31 = vmul.f32 %v387_v22, %v887_v15  ;;  %v386_v35 = vadd.f32 %v371_v29, %v361_v20  ;;  %v391_v36 = vmul.f32 %v383_v25, %v875_v11 }
  0xd7   : > { %v398_v33 = vmul.f32 %v390_v26, %v900_v24  ;;  %v396_v34 = vmul.f32 %v388_v27, %v890_v16  ;;  %v392_v15 = vmul.f32 %v384_v28, %v878_v12  ;;  %v393_v23 = vmul.f32 %v385_v32, %v881_v13 }
  0xd8   : > { %405 = vst [vmem:[%s251_s20 + $0x30] sm:$0xff] %v397_v30  ;;  %v394_v16 = vmul.f32 %v386_v35, %v884_v14 }
  0xd9   : > { %406 = vst [vmem:[%s251_s20 + $0x38] sm:$0xff] %v398_v33 }
  0xda   : > { %403 = vst [vmem:[%s251_s20 + $0x20] sm:$0xff] %v395_v31 }
  0xdb   : > { %404 = vst [vmem:[%s251_s20 + $0x28] sm:$0xff] %v396_v34 }
  0xdc   : > { %399 = vst [vmem:[%s251_s20] sm:$0xff] %v391_v36 }
  0xdd   : > { %400 = vst [vmem:[%s251_s20 + $0x8] sm:$0xff] %v392_v15 }
  0xde   : > { %401 = vst [vmem:[%s251_s20 + $0x10] sm:$0xff] %v393_v23 }
  0xdf   : > { %402 = vst [vmem:[%s251_s20 + $0x18] sm:$0xff] %v394_v16 }
  0xe0   : > { %681 = shalt.err (!%p678_p0)
}
  0xe1   : > { %s741_s23 = smov 256   ;;  %s742_s3 = smov 16  }
  0xe2   : > { %548 = dma.vmem_to_hbm [thread:$0]  (%p822_p9), %s423_s9, 1024, %s425_s10, %s408_s25, %s741_s23, %s741_s23, %s742_s3  }
  0xe3 PF: > { %s439_s27 = sand.u32 1, %s716_s17   ;;  %p555_p1 = pnand %p527_p12, %p829_p11 }
  0xe4   : > { %s440_s26 = scalar_lea.sflag [#allocation5], %s439_s27 }
  0xe5   : > { %p556_p2 = pneg %p555_p1 }
  0xe7   : > { %711 = dma.done.wait (%p556_p2), %s440_s26, 1024  }
  0xe8   : > { %713 = vsyncadd (%p556_p2), %s440_s26, 4294966272  ;;  %s21_s22 = sadd.s32 1, %s736_s22   ;;  %s963_s17 = smov %s720_s18 }
  0xe9   : > { %p18_p3 = scmp.ge.s32.totalorder %s21_s22, 4   ;;  %s964_s18 = smov %s724_s19 }
  0xea   : > { %s965_s19 = smov %s827_s30  ;;  %s966_s20 = smov %s732_s21 }
  0xeb   : > { %s967_s21 = smov %s969_s24  ;;  %20 = sbr.rel (!%p18_p3) target bundleno = 8 (0x8), region = 84 }
  0xf0   :  { %446 = vsyncpa [#allocation4], 1 }
  0xf1   :  { %448 = vsyncpa [#allocation4 + $0x1], 1 }
  0xf2   :  { %449 = vsyncpa [#allocation5], 1 }
  0xf3   :  { %451 = vsyncpa [#allocation5 + $0x1], 1 }

</bundles_post_ra>
